<compile_context>
chip_gen: v7x
topology: tpu7x:2x2x1
jax: 0.10.0
libtpu: 0.0.40
codegen_flags: <defaults>
</compile_context>

<pallas_src>
import functools
import math

import jax
import jax.numpy as jnp
from jax.experimental import pallas as pl
from jax.experimental.pallas import tpu as pltpu


def _round_up(x, m):
    return (x + m - 1) // m * m


def _vmem_capacity_bytes():
    """Physical VMEM per TensorCore; conservative fallback if the query is unavailable."""
    try:
        cap = getattr(pltpu.get_tpu_info(), "vmem_capacity_bytes", None)
        if cap:
            return int(cap)
    except Exception:
        pass
    return 64 * 1024 * 1024  # v7x per-TC size: safe lower bound on all generations


# ----------------------------- kernels ---------------------------------------

def _ffn_resident_kernel(x_ref, w1_ref, b1_ref, w2_ref, b2_ref, o_ref, *, compute_dtype):
    # Grid: (row blocks,).  W1^T / W2^T fully VMEM-resident (constant index_map).
    x = x_ref[...].astype(compute_dtype)
    h = jnp.dot(x, w1_ref[...], preferred_element_type=jnp.float32)
    h = jnp.maximum(h + b1_ref[...], 0.0)
    # Dropout (eval mode) == identity.
    # TODO(synk): training-mode dropout would need pltpu.prng_seed/prng_random_bits masking.
    out = jnp.dot(h.astype(compute_dtype), w2_ref[...], preferred_element_type=jnp.float32)
    o_ref[...] = (out + b2_ref[...]).astype(o_ref.dtype)


def _ffn_stream_kernel(x_ref, w1_ref, b1_ref, w2_ref, b2_ref, o_ref, acc_ref, *, compute_dtype):
    # Grid: (row blocks [parallel], hidden blocks [arbitrary, last]).
    # x_ref:  (tm, model_dim)            resident across the hidden axis
    # w1_ref: (model_dim, th)  b1_ref: (1, th)
    # w2_ref: (th, model_dim)  b2_ref: (1, model_dim)
    # acc_ref: VMEM (tm, model_dim) f32 accumulator
    j = pl.program_id(1)

    @pl.when(j == 0)
    def _init():
        # Fold b2 into the accumulator init: finalize becomes a pure cast + store.
        acc_ref[...] = jnp.broadcast_to(b2_ref[...], acc_ref.shape).astype(jnp.float32)

    x = x_ref[...].astype(compute_dtype)
    h = jnp.dot(x, w1_ref[...], preferred_element_type=jnp.float32)
    h = jnp.maximum(h + b1_ref[...], 0.0)
    # Dropout (eval mode) == identity.
    acc_ref[...] += jnp.dot(h.astype(compute_dtype), w2_ref[...],
                            preferred_element_type=jnp.float32)

    @pl.when(j == pl.num_programs(1) - 1)
    def _finalize():
        o_ref[...] = acc_ref[...].astype(o_ref.dtype)


# ------------------------- VMEM footprint models -----------------------------

def _resident_vmem_bytes(tm, d, h, x_it, o_it, w_it):
    return (2 * 2 * d * h * w_it          # W1^T + W2^T (Pallas double-buffers each input)
            + 2 * tm * d * x_it           # x tile
            + 2 * tm * d * o_it           # out tile
            + 2 * (h + d) * 4             # biases
            + tm * h * 6                  # hidden f32 + compute-dtype copy (Mosaic temps)
            + tm * d * 4)                 # f32 pre-cast output temp


def _stream_vmem_bytes(tm, th, d, x_it, o_it, w_it):
    return (2 * 2 * d * th * w_it         # W1/W2 hidden blocks, double-buffered
            + 2 * th * 4 + 2 * d * 4      # b1 block, b2
            + 2 * tm * d * x_it
            + 2 * tm * d * o_it
            + tm * d * 4                  # f32 accumulator scratch
            + tm * th * 6)                # hidden f32 + compute-dtype copy


# ------------------------------- wrapper --------------------------------------

def feed_forward(inputs, w1, b1, w2, b2, *, compute_dtype=jnp.bfloat16,
                 tm=None, th=None, mode="auto"):
    """Position-wise FFN: relu(x @ W1^T + b1) @ W2^T + b2.

    inputs: [batch, len, model_dim]
    w1: [hidden, model] (PyTorch nn.Linear layout), b1: [hidden]
    w2: [model, hidden],                            b2: [model]
    compute_dtype: MXU input dtype (bf16 default; accumulation is always f32).
    mode: "auto" | "resident" | "stream".
    """
    batch, seq, model_dim = inputs.shape
    hidden_dim = w1.shape[0]
    out_dtype = inputs.dtype
    x_item = jnp.dtype(inputs.dtype).itemsize
    out_item = jnp.dtype(out_dtype).itemsize
    w_item = jnp.dtype(compute_dtype).itemsize

    # ---- glue (done once, outside the kernel) --------------------------------
    w1_t = w1.T.astype(compute_dtype)                       # (model_dim, hidden_dim)
    w2_t = w2.T.astype(compute_dtype)                       # (hidden_dim, model_dim)
    b1_2d = b1.reshape(1, hidden_dim).astype(jnp.float32)
    b2_2d = b2.reshape(1, model_dim).astype(jnp.float32)

    x = inputs.reshape(batch * seq, model_dim)
    M = x.shape[0]

    # ---- per-generation VMEM budget ------------------------------------------
    vmem_cap = _vmem_capacity_bytes()            # 64 MiB (v7x) / 128 MiB (v5e, v6e)
    vmem_budget = int(vmem_cap * 0.75)           # headroom for Mosaic internal temps
    vmem_limit = int(vmem_cap * 0.875)           # ~56 MiB on v7x, ~112 MiB on v5e/v6e

    # ---- row tile -------------------------------------------------------------
    sub = max(8, 32 // max(1, min(x_item, out_item)))   # 8 (f32), 16 (bf16), 32 (i8)
    tm_target = tm if tm is not None else (1024 if vmem_cap >= 96 * 1024 * 1024 else 512)
    tm_eff = min(_round_up(tm_target, sub), _round_up(M, sub))
    if M >= 512:
        # Keep >=2 row blocks so the "parallel" axis can shard across v7x's two TensorCores.
        tm_eff = min(tm_eff, max(256, _round_up(pl.cdiv(M, 2), 128)))

    # Pad rows only to the sublane multiple (<= sub-1 rows); partial last row blocks are
    # handled by Pallas boundary clipping (no pad-to-tile copy / wasted compute).
    M_pad = _round_up(M, sub)
    if M_pad != M:
        x = jnp.pad(x, ((0, M_pad - M), (0, 0)))
    grid_m = pl.cdiv(M_pad, tm_eff)

    # ---- choose execution mode -------------------------------------------------
    resident_fits = _resident_vmem_bytes(
        tm_eff, model_dim, hidden_dim, x_item, out_item, w_item) <= vmem_budget
    use_resident = (mode == "resident") or (mode == "auto" and resident_fits)

    if use_resident:
        flops = 4 * M_pad * model_dim * hidden_dim
        bytes_accessed = int(x.size * x_item
                             + (w1_t.size + w2_t.size) * w_item      # weights read once
                             + (hidden_dim + model_dim) * 4
                             + M_pad * model_dim * out_item)
        kernel = functools.partial(_ffn_resident_kernel, compute_dtype=compute_dtype)
        out = pl.pallas_call(
            kernel,
            out_shape=jax.ShapeDtypeStruct((M_pad, model_dim), out_dtype),
            grid_spec=pltpu.PrefetchScalarGridSpec(
                num_scalar_prefetch=0,
                grid=(grid_m,),
                in_specs=[
                    pl.BlockSpec((tm_eff, model_dim), lambda i: (i, 0)),      # x rows
                    pl.BlockSpec((model_dim, hidden_dim), lambda i: (0, 0)),  # W1^T (resident)
                    pl.BlockSpec((1, hidden_dim), lambda i: (0, 0)),          # b1
                    pl.BlockSpec((hidden_dim, model_dim), lambda i: (0, 0)),  # W2^T (resident)
                    pl.BlockSpec((1, model_dim), lambda i: (0, 0)),           # b2
                ],
                out_specs=pl.BlockSpec((tm_eff, model_dim), lambda i: (i, 0)),
            ),
            compiler_params=pltpu.CompilerParams(
                dimension_semantics=("parallel",),
                vmem_limit_bytes=vmem_limit,
            ),
            cost_estimate=pl.CostEstimate(
                flops=flops, transcendentals=0, bytes_accessed=bytes_accessed),
        )(x, w1_t, b1_2d, w2_t, b2_2d)
        return out[:M].reshape(batch, seq, model_dim)

    # ---- streaming mode: pick (tm, th) to fit the VMEM budget -------------------
    h_round = _round_up(hidden_dim, 128)
    th_candidates = [2048, 1024, 512, 256, 128] if th is None else [_round_up(th, 128)]
    tm_candidates = sorted({tm_eff, 512, 256, 128}, reverse=True)
    tm_candidates = [t for t in tm_candidates if t <= tm_eff]
    tm_sel, th_sel = tm_candidates[-1], th_candidates[-1]
    found = False
    for t_m in tm_candidates:
        for t_h in th_candidates:
            if _stream_vmem_bytes(t_m, min(t_h, h_round), model_dim,
                                  x_item, out_item, w_item) <= vmem_budget:
                tm_sel, th_sel = t_m, t_h
                found = True
                break
        if found:
            break
    tm_eff = tm_sel
    th_eff = min(th_sel, h_round)
    grid_m = pl.cdiv(M_pad, tm_eff)

    H_pad = _round_up(hidden_dim, th_eff)
    if H_pad != hidden_dim:
        # Zero-padded hidden units: relu(x@0 + 0) = 0 and zero W2 rows -> no contribution.
        w1_t = jnp.pad(w1_t, ((0, 0), (0, H_pad - hidden_dim)))
        b1_2d = jnp.pad(b1_2d, ((0, 0), (0, H_pad - hidden_dim)))
        w2_t = jnp.pad(w2_t, ((0, H_pad - hidden_dim), (0, 0)))

    grid = (grid_m, H_pad // th_eff)

    flops = 4 * M_pad * model_dim * H_pad
    bytes_accessed = int(x.size * x_item
                         + grid_m * (w1_t.size + w2_t.size) * w_item  # weights re-streamed per row tile
                         + grid_m * (H_pad + model_dim) * 4
                         + M_pad * model_dim * out_item)

    kernel = functools.partial(_ffn_stream_kernel, compute_dtype=compute_dtype)
    # NOTE: if profiles show exposed weight DMA here, sweep pipeline_mode=pl.Buffered(3)
    # on the W1/W2 specs (v5e/v6e) or pl.Buffered(1) on the j-invariant x spec (v7x).
    out = pl.pallas_call(
        kernel,
        out_shape=jax.ShapeDtypeStruct((M_pad, model_dim), out_dtype),
        grid_spec=pltpu.PrefetchScalarGridSpec(
            num_scalar_prefetch=0,
            grid=grid,
            in_specs=[
                pl.BlockSpec((tm_eff, model_dim), lambda i, j: (i, 0)),   # x rows (resident over j)
                pl.BlockSpec((model_dim, th_eff), lambda i, j: (0, j)),   # W1^T hidden block
                pl.BlockSpec((1, th_eff),         lambda i, j: (0, j)),   # b1 hidden block
                pl.BlockSpec((th_eff, model_dim), lambda i, j: (j, 0)),   # W2^T hidden block
                pl.BlockSpec((1, model_dim),      lambda i, j: (0, 0)),   # b2 (constant)
            ],
            out_specs=pl.BlockSpec((tm_eff, model_dim), lambda i, j: (i, 0)),
            scratch_shapes=[pltpu.VMEM((tm_eff, model_dim), jnp.float32)],
        ),
        compiler_params=pltpu.CompilerParams(
            dimension_semantics=("parallel", "arbitrary"),
            vmem_limit_bytes=vmem_limit,
        ),
        cost_estimate=pl.CostEstimate(
            flops=flops, transcendentals=0, bytes_accessed=bytes_accessed),
    )(x, w1_t, b1_2d, w2_t, b2_2d)

    return out[:M].reshape(batch, seq, model_dim)


# ------------------------------- references -----------------------------------

def xavier_uniform(key, shape, fan_in, fan_out, dtype=jnp.float32):
    # Matches torch.nn.init.xavier_uniform_ (gain=1).
    bound = math.sqrt(6.0 / (fan_in + fan_out))
    return jax.random.uniform(key, shape, dtype=dtype, minval=-bound, maxval=bound)


def reference_ffn_f32(inputs, w1, b1, w2, b2):
    h = jnp.maximum(inputs @ w1.T + b1, 0.0)
    return h @ w2.T + b2


def reference_ffn_compute(inputs, w1, b1, w2, b2, compute_dtype):
    # Emulates the kernel's numerics: compute_dtype MXU inputs, f32 accumulation.
    cd = compute_dtype
    h = jnp.dot(inputs.astype(cd), w1.T.astype(cd), preferred_element_type=jnp.float32) + b1
    h = jnp.maximum(h, 0.0)
    out = jnp.dot(h.astype(cd), w2.T.astype(cd), preferred_element_type=jnp.float32) + b2
    return out.astype(inputs.dtype)


if __name__ == "__main__":
    # Small but lane-aligned (model_dim multiple of 128 -> unmasked output stores);
    # seq=9 exercises the partial/padded row path (M=18 -> row pad to 24).
    batch, seq, model_dim, hidden_dim = 2, 9, 128, 256

    key = jax.random.PRNGKey(0)
    k_x, k_w1, k_w2, k_b1, k_b2 = jax.random.split(key, 5)

    x = jax.random.normal(k_x, (batch, seq, model_dim), dtype=jnp.float32)

    # XavierLinear parameters (PyTorch nn.Linear layout: weight [out, in], bias [out]).
    w1 = xavier_uniform(k_w1, (hidden_dim, model_dim), model_dim, hidden_dim)
    b1 = 0.01 * jax.random.normal(k_b1, (hidden_dim,), jnp.float32)
    w2 = xavier_uniform(k_w2, (model_dim, hidden_dim), hidden_dim, model_dim)
    b2 = 0.01 * jax.random.normal(k_b2, (model_dim,), jnp.float32)

    ref_f32 = reference_ffn_f32(x, w1, b1, w2, b2)
    ref_bf16 = reference_ffn_compute(x, w1, b1, w2, b2, jnp.bfloat16)

    # 1) Default path: auto mode (resident weights), bf16 MXU compute.
    out = jax.block_until_ready(feed_forward(x, w1, b1, w2, b2))
    assert out.shape == (batch, seq, model_dim)
    assert jnp.allclose(out, ref_bf16, atol=2e-2, rtol=2e-2), "resident/bf16 mismatch"
    assert jnp.allclose(out, ref_f32, atol=1e-1, rtol=1e-1), "resident/bf16 far from f32 ref"

    # 2) Forced hidden-streaming path (exercises accumulator + multi hidden blocks).
    out_s = jax.block_until_ready(
        feed_forward(x, w1, b1, w2, b2, mode="stream", th=128))
    assert jnp.allclose(out_s, ref_bf16, atol=2e-2, rtol=2e-2), "stream/bf16 mismatch"

    # 3) Exact-ish f32 compute path.
    out_f32 = jax.block_until_ready(
        feed_forward(x, w1, b1, w2, b2, compute_dtype=jnp.float32))
    assert jnp.allclose(out_f32, ref_f32, atol=1e-4, rtol=1e-4), "f32 mismatch"

    print("KERNEL_OK")
</pallas_src>

<mosaic_0001>
module attributes {stable_mosaic.version = 11 : i64} {
  func.func @_ffn_resident_kernel(%arg0: i32, %arg1: memref<24x128xf32, #tpu.memory_space<vmem>>, %arg2: memref<128x256xbf16, #tpu.memory_space<vmem>>, %arg3: memref<1x256xf32, #tpu.memory_space<vmem>>, %arg4: memref<256x128xbf16, #tpu.memory_space<vmem>>, %arg5: memref<1x128xf32, #tpu.memory_space<vmem>>, %arg6: memref<24x128xf32, #tpu.memory_space<vmem>>) attributes {dimension_semantics = [#tpu.dimension_semantics<parallel>], iteration_bounds = array<i64: 1>, scalar_prefetch = 0 : i64, scratch_operands = 0 : i64, tpu.core_type = #tpu.core_type<tc>, window_params = [{transform_indices = @transform_0, window_bounds = array<i64: 24, 128>}, {pipeline_mode = #tpu.pipeline_mode<synchronous>, transform_indices = @transform_1, window_bounds = array<i64: 128, 256>}, {pipeline_mode = #tpu.pipeline_mode<synchronous>, transform_indices = @transform_2, window_bounds = array<i64: 1, 256>}, {pipeline_mode = #tpu.pipeline_mode<synchronous>, transform_indices = @transform_3, window_bounds = array<i64: 256, 128>}, {pipeline_mode = #tpu.pipeline_mode<synchronous>, transform_indices = @transform_4, window_bounds = array<i64: 1, 128>}, {transform_indices = @transform_5, window_bounds = array<i64: 24, 128>}]} {
    %c0 = arith.constant 0 : index
    %c0_0 = arith.constant 0 : index
    %0 = vector.load %arg1[%c0, %c0_0] : memref<24x128xf32, #tpu.memory_space<vmem>>, vector<24x128xf32>
    %1 = arith.truncf %0 : vector<24x128xf32> to vector<24x128xbf16>
    %c0_1 = arith.constant 0 : index
    %c0_2 = arith.constant 0 : index
    %2 = vector.load %arg2[%c0_1, %c0_2] : memref<128x256xbf16, #tpu.memory_space<vmem>>, vector<128x256xbf16>
    %cst = arith.constant dense<0.000000e+00> : vector<24x256xf32>
    %3 = tpu.matmul %1, %2, %cst {dimension_numbers = #tpu.dot_dimension_numbers<[1], [0], [0], [1], [0, 0, 1, 1], [], []>} : vector<24x128xbf16>, vector<128x256xbf16>, vector<24x256xf32> -> vector<24x256xf32>
    %c0_3 = arith.constant 0 : index
    %c0_4 = arith.constant 0 : index
    %4 = vector.load %arg3[%c0_3, %c0_4] : memref<1x256xf32, #tpu.memory_space<vmem>>, vector<1x256xf32>
    %5 = vector.broadcast %4 : vector<1x256xf32> to vector<24x256xf32>
    %6 = arith.addf %3, %5 : vector<24x256xf32>
    %cst_5 = arith.constant 0.000000e+00 : f32
    %7 = vector.broadcast %cst_5 : f32 to vector<24x256xf32>
    %8 = arith.maximumf %6, %7 : vector<24x256xf32>
    %9 = arith.truncf %8 : vector<24x256xf32> to vector<24x256xbf16>
    %c0_6 = arith.constant 0 : index
    %c0_7 = arith.constant 0 : index
    %10 = vector.load %arg4[%c0_6, %c0_7] : memref<256x128xbf16, #tpu.memory_space<vmem>>, vector<256x128xbf16>
    %cst_8 = arith.constant dense<0.000000e+00> : vector<24x128xf32>
    %11 = tpu.matmul %9, %10, %cst_8 {dimension_numbers = #tpu.dot_dimension_numbers<[1], [0], [0], [1], [0, 0, 1, 1], [], []>} : vector<24x256xbf16>, vector<256x128xbf16>, vector<24x128xf32> -> vector<24x128xf32>
    %c0_9 = arith.constant 0 : index
    %c0_10 = arith.constant 0 : index
    %12 = vector.load %arg5[%c0_9, %c0_10] : memref<1x128xf32, #tpu.memory_space<vmem>>, vector<1x128xf32>
    %13 = vector.broadcast %12 : vector<1x128xf32> to vector<24x128xf32>
    %14 = arith.addf %11, %13 : vector<24x128xf32>
    %c0_11 = arith.constant 0 : index
    %c0_12 = arith.constant 0 : index
    %15 = vector.load %arg6[%c0_11, %c0_12] : memref<24x128xf32, #tpu.memory_space<vmem>>, vector<24x128xf32>
    tpu.vector_store %arg6[%c0_11, %c0_12], %14 {strides = array<i32>} : memref<24x128xf32, #tpu.memory_space<vmem>>, vector<24x128xf32>,
    return
  }
  func.func @transform_0(%arg0: i32) -> (i32, i32) {
    %c0_i32 = arith.constant 0 : i32
    %c0_i32_0 = arith.constant 0 : i32
    return %arg0, %c0_i32 : i32, i32
  }
  func.func @transform_1(%arg0: i32) -> (i32, i32) {
    %c0_i32 = arith.constant 0 : i32
    %c0_i32_0 = arith.constant 0 : i32
    %c0_i32_1 = arith.constant 0 : i32
    return %c0_i32, %c0_i32_0 : i32, i32
  }
  func.func @transform_2(%arg0: i32) -> (i32, i32) {
    %c0_i32 = arith.constant 0 : i32
    %c0_i32_0 = arith.constant 0 : i32
    %c0_i32_1 = arith.constant 0 : i32
    return %c0_i32, %c0_i32_0 : i32, i32
  }
  func.func @transform_3(%arg0: i32) -> (i32, i32) {
    %c0_i32 = arith.constant 0 : i32
    %c0_i32_0 = arith.constant 0 : i32
    %c0_i32_1 = arith.constant 0 : i32
    return %c0_i32, %c0_i32_0 : i32, i32
  }
  func.func @transform_4(%arg0: i32) -> (i32, i32) {
    %c0_i32 = arith.constant 0 : i32
    %c0_i32_0 = arith.constant 0 : i32
    %c0_i32_1 = arith.constant 0 : i32
    return %c0_i32, %c0_i32_0 : i32, i32
  }
  func.func @transform_5(%arg0: i32) -> (i32, i32) {
    %c0_i32 = arith.constant 0 : i32
    %c0_i32_0 = arith.constant 0 : i32
    return %arg0, %c0_i32 : i32, i32
  }
}

</mosaic_0001>

<bundles_post_ra>
// kernel: tpu_custom_call.1
= control target key start
LH: loop header
LB: loop body
LE: loop exit
PB: predicated region body
PF: predicated region fallthrough
CT: control target
= control target key end

     0   :  { %10 = vsyncpa [#allocation3], 0  ;;  %s754_s0 = inlined_call_operand.hbm [shape: f32[24,128], index: 0, kind: input, shape index: {}]   ;;  %s755_s1 = inlined_call_operand.hbm [shape: bf16[128,256], index: 1, kind: input, shape index: {}]   ;;  %s756_s2 = inlined_call_operand.vmem [shape: f32[1,256], index: 2, kind: input, shape index: {}]   ;;  %s757_s3 = inlined_call_operand.hbm [shape: bf16[256,128], index: 3, kind: input, shape index: {}]   ;;  %s758_s4 = inlined_call_operand.vmem [shape: f32[1,128], index: 4, kind: input, shape index: {}]   ;;  %s759_s5 = inlined_call_operand.hbm [shape: f32[24,128], index: 5, kind: output, shape index: {}]  }
   0x1   :  { %11 = vsyncpa [#allocation6], 0 }
   0x2   :  { %12 = vsyncpa [#allocation4], 0  ;;  %s645_s18 = smov [#allocation5]   ;;  %s646_s20 = smov [#allocation2]  }
   0x3   :  { %s30_s19 = sshll.u32 %s645_s18, 4  ;;  %s18_s21 = sshll.u32 %s646_s20, 4  ;;  %s31_s19 = int_to_ptr.vmem [resolvable:$true] %s30_s19  ;;  %s684_s21 = int_to_ptr.vmem [resolvable:$true] %s18_s21 }
   0x4   :  { %s551_s24 = scalar_lea.hbm %s755_s1, 2048 }
   0x5   :  { %p552_p0 = scmp.ne.s32.totalorder %s755_s1, %s551_s24  ;;  %p555_p1 = scmp.lt.u32.totalorder %s551_s24, %s755_s1 }
   0x7   :  { %p557_p2 = pnand %p555_p1, %p552_p0 }
   0x9   :  { %560 = shalt.err (!%p557_p2)
}
   0xa   :  { %s561_s29 = scalar_lea.vmem %s31_s19, 2048  ;;  %p566_p4 = scmp.lt.s32.totalorder %s31_s19, %s31_s19 }
   0xb   :  { %p562_p3 = scmp.ne.s32.totalorder %s31_s19, %s561_s29  ;;  %p567_p5 = scmp.lt.s32.totalorder %s561_s29, %s561_s29 }
   0xd   :  { %p568_p6 = por %p567_p5, %p566_p4 }
   0xf   :  { %p569_p7 = pnand %p568_p6, %p562_p3 }
  0x11   :  { %572 = shalt.err (!%p569_p7)
}
  0x12   :  { %s647_s30 = smov 128   ;;  %s648_s6 = smov 8  }
  0x13   :  { %36 = dma.hbm_to_vmem [thread:$0]  %s755_s1, 2048, %s31_s19, [#allocation6], %s647_s30, %s647_s30, %s648_s6  }
  0x14   :  { %s573_s11 = scalar_lea.hbm %s754_s0, 384 }
  0x15   :  { %p574_p8 = scmp.ne.s32.totalorder %s754_s0, %s573_s11  ;;  %p577_p9 = scmp.lt.u32.totalorder %s573_s11, %s754_s0 }
  0x17   :  { %p579_p10 = pnand %p577_p9, %p574_p8 }
  0x19   :  { %582 = shalt.err (!%p579_p10)
}
  0x1a   :  { %s583_s16 = scalar_lea.vmem %s684_s21, 384  ;;  %p588_p12 = scmp.lt.s32.totalorder %s684_s21, %s684_s21 }
  0x1b   :  { %p584_p11 = scmp.ne.s32.totalorder %s684_s21, %s583_s16  ;;  %p589_p13 = scmp.lt.s32.totalorder %s583_s16, %s583_s16 }
  0x1d   :  { %p590_p0 = por %p589_p13, %p588_p12 }
  0x1f   :  { %p591_p1 = pnand %p590_p0, %p584_p11 }
  0x21   :  { %594 = shalt.err (!%p591_p1)
}
  0x22   :  { %24 = dma.hbm_to_vmem [thread:$0]  %s754_s0, 384, %s684_s21, [#allocation3], %s647_s30, %s647_s30, %s648_s6  }
  0x23   :  { %s649_s18 = smov [#allocation7]   ;;  %s595_s23 = scalar_lea.hbm %s757_s3, 2048 }
  0x24   :  { %s44_s19 = sshll.u32 %s649_s18, 4  ;;  %p596_p2 = scmp.ne.s32.totalorder %s757_s3, %s595_s23  ;;  %s45_s19 = int_to_ptr.vmem [resolvable:$true] %s44_s19 }
  0x25   :  { %p599_p3 = scmp.lt.u32.totalorder %s595_s23, %s757_s3 }
  0x27   :  { %p601_p4 = pnand %p599_p3, %p596_p2 }
  0x29   :  { %604 = shalt.err (!%p601_p4)
}
  0x2a   :  { %s605_s28 = scalar_lea.vmem %s45_s19, 2048  ;;  %p610_p6 = scmp.lt.s32.totalorder %s45_s19, %s45_s19 }
  0x2b   :  { %p606_p5 = scmp.ne.s32.totalorder %s45_s19, %s605_s28  ;;  %p611_p7 = scmp.lt.s32.totalorder %s605_s28, %s605_s28 }
  0x2d   :  { %p612_p8 = por %p611_p7, %p610_p6 }
  0x2f   :  { %p613_p9 = pnand %p612_p8, %p606_p5 }
  0x31   :  { %616 = shalt.err (!%p613_p9)
}
  0x32   :  { %s650_s0 = smov 64   ;;  %s651_s21 = smov 4  }
  0x33   :  { %50 = dma.hbm_to_vmem [thread:$0]  %s757_s3, 2048, %s45_s19, [#allocation6], %s650_s0, %s650_s0, %s651_s21  }
  0x34   :  { %639 = dma.done.wait [#allocation3], 384  }
  0x35   :  { %640 = vsyncadd [#allocation3], 4294966912 }
  0x36   :  { %641 = dma.done.wait [#allocation6], 4096  }
  0x37   :  { %642 = vsyncadd [#allocation6], 4294963200  ;;  %v652_v0 = vmov 0   ;;  %v511_v1 = vld [vmem:[#allocation5 + $0x4] ss:$8 sps:$4 sm:$0xff]   ;;  %v539_v16 = vld [vmem:[#allocation7 + $0x50] sm:$0xff]   ;;  %v86_v38 = vlaneseq }
  0x38   :  { %208 = vmatprep.mubr.bf16.mxu0 %v652_v0  ;;  %v513_v2 = vld [vmem:[#allocation5] ss:$8 sps:$4 sm:$0xff]   ;;  %176 = vmatprep.subr.bf16.mxu0 %v511_v1  ;;  %v514_v3 = vld [vmem:[#allocation5 + $0x14] ss:$8 sps:$4 sm:$0xff]   ;;  %v516_v4 = vld [vmem:[#allocation5 + $0x10] ss:$8 sps:$4 sm:$0xff]  }
  0x39   :  { %177 = vmatpush1.bf16.msra.mxu0 %v513_v2  ;;  %v517_v5 = vld [vmem:[#allocation5 + $0x24] ss:$8 sps:$4 sm:$0xff]   ;;  %v519_v6 = vld [vmem:[#allocation5 + $0x20] ss:$8 sps:$4 sm:$0xff]   ;;  %v520_v7 = vld [vmem:[#allocation5 + $0x34] ss:$8 sps:$4 sm:$0xff]  }
  0x3a   :  { %178 = vmatprep.subr.bf16.mxu0 %v514_v3  ;;  %v522_v8 = vld [vmem:[#allocation5 + $0x30] ss:$8 sps:$4 sm:$0xff]   ;;  %v523_v9 = vld [vmem:[#allocation5 + $0x44] ss:$8 sps:$4 sm:$0xff]   ;;  %v525_v11 = vld [vmem:[#allocation5 + $0x40] ss:$8 sps:$4 sm:$0xff]  }
  0x3b   :  { %v535_v10 = vld [vmem:[#allocation7 + $0x40] sm:$0xff]   ;;  %v526_v13 = vld [vmem:[#allocation5 + $0x54] ss:$8 sps:$4 sm:$0xff]   ;;  %v537_v14 = vld [vmem:[#allocation7 + $0x48] sm:$0xff]   ;;  %v87_v39 = vshrl.u32 %v86_v38, 7  ;;  %s653_s10 = smov [#allocation8]  }
  0x3c   :  { %v536_v12 = vld [vmem:[#allocation7] sm:$0xff]   ;;  %474 = vmatprep.subr.bf16.mxu1 %v535_v10  ;;  %v538_v15 = vld [vmem:[#allocation7 + $0x8] sm:$0xff]   ;;  %v528_v17 = vld [vmem:[#allocation5 + $0x50] ss:$8 sps:$4 sm:$0xff]   ;;  %s428_s11 = sshll.u32 %s653_s10, 4  ;;  %s429_s11 = int_to_ptr.vmem [resolvable:$true] %s428_s11 }
  0x3d   :  { %179 = vmatpush1.bf16.msra.mxu0 %v516_v4  ;;  %475 = vmatpush3.bf16.msra.mxu1 %v536_v12  ;;  %v529_v18 = vld [vmem:[#allocation5 + $0x64] ss:$8 sps:$4 sm:$0xff]   ;;  %v540_v19 = vld [vmem:[#allocation7 + $0x10] sm:$0xff]   ;;  %v541_v20 = vld [vmem:[#allocation7 + $0x58] sm:$0xff]   ;;  %v88_v40 = vsub.s32 0, %v87_v39  ;;  %v92_v42 = vsub.s32 1, %v87_v39  ;;  %p622_p11 = scmp.lt.s32.totalorder %s429_s11, %s429_s11 }
  0x3e   :  { %180 = vmatprep.subr.bf16.mxu0 %v517_v5  ;;  %476 = vmatprep.subr.bf16.mxu1 %v537_v14  ;;  %v531_v21 = vld [vmem:[#allocation5 + $0x60] ss:$8 sps:$4 sm:$0xff]   ;;  %v532_v22 = vld [vmem:[#allocation5 + $0x74] ss:$8 sps:$4 sm:$0xff]   ;;  %v534_v25 = vld [vmem:[#allocation5 + $0x70] ss:$8 sps:$4 sm:$0xff]  }
  0x3f   :  { %v542_v23 = vld [vmem:[#allocation7 + $0x18] sm:$0xff]   ;;  %v543_v24 = vld [vmem:[#allocation7 + $0x60] sm:$0xff]   ;;  %v63_v26 = vld [vmem:[#allocation2] sm:$0xff] }
  0x40   :  { %v64_v27 = vld [vmem:[#allocation2 + $0x8] sm:$0xff]  ;;  %v544_v28 = vld [vmem:[#allocation7 + $0x20] sm:$0xff]   ;;  %v545_v29 = vld [vmem:[#allocation7 + $0x68] sm:$0xff]  }
  0x41   :  { %181 = vmatpush1.bf16.msra.mxu0 %v519_v6  ;;  %477 = vmatpush3.bf16.msra.mxu1 %v538_v15  ;;  %v66_v30 = vpack.c.bf16 %v64_v27, %v63_v26  ;;  %v65_v31 = vld [vmem:[#allocation2 + $0x10] sm:$0xff]  ;;  %v546_v33 = vld [vmem:[#allocation7 + $0x28] sm:$0xff]   ;;  %v547_v34 = vld [vmem:[#allocation7 + $0x70] sm:$0xff]  }
  0x42   :  { %182 = vmatprep.subr.bf16.mxu0 %v520_v7  ;;  %478 = vmatprep.subr.bf16.mxu1 %v539_v16  ;;  %v67_v32 = vpack.c.bf16 %v65_v31, %v65_v31  ;;  %v548_v35 = vld [vmem:[#allocation7 + $0x30] sm:$0xff]   ;;  %v549_v36 = vld [vmem:[#allocation7 + $0x78] sm:$0xff]   ;;  %v84_v41 = vld [vmem:[%s756_s2] sm:$0x3] }
  0x43   :  { %v550_v37 = vld [vmem:[#allocation7 + $0x38] sm:$0xff]   ;;  %v89_v43 = vrot.slane %v84_v41, %v88_v40  ;;  %v93_v44 = vrot.slane %v84_v41, %v92_v42  ;;  %v457_v6 = vld [vmem:[%s758_s4] ss:$0 sm:$0xff]  ;;  %s617_s4 = scalar_lea.vmem %s429_s11, 384 }
  0x44   :  { %p618_p10 = scmp.ne.s32.totalorder %s429_s11, %s617_s4  ;;  %p623_p12 = scmp.lt.s32.totalorder %s617_s4, %s617_s4 }
  0x45   :  { %183 = vmatpush1.bf16.msra.mxu0 %v522_v8  ;;  %479 = vmatpush3.bf16.msra.mxu1 %v540_v19 }
  0x46   :  { %184 = vmatprep.subr.bf16.mxu0 %v523_v9  ;;  %480 = vmatprep.subr.bf16.mxu1 %v541_v20  ;;  %p624_p13 = por %p623_p12, %p622_p11 }
  0x48   :  { %p625_p0 = pnand %p624_p13, %p618_p10 }
  0x49   :  { %185 = vmatpush1.bf16.msra.mxu0 %v525_v11  ;;  %481 = vmatpush3.bf16.msra.mxu1 %v542_v23 }
  0x4a   :  { %186 = vmatprep.subr.bf16.mxu0 %v526_v13  ;;  %482 = vmatprep.subr.bf16.mxu1 %v543_v24 }
  0x4d   :  { %187 = vmatpush1.bf16.msra.mxu0 %v528_v17  ;;  %483 = vmatpush3.bf16.msra.mxu1 %v544_v28 }
  0x4e   :  { %188 = vmatprep.subr.bf16.mxu0 %v529_v18  ;;  %484 = vmatprep.subr.bf16.mxu1 %v545_v29 }
  0x51   :  { %189 = vmatpush1.bf16.msra.mxu0 %v531_v21  ;;  %485 = vmatpush3.bf16.msra.mxu1 %v546_v33 }
  0x52   :  { %190 = vmatprep.subr.bf16.mxu0 %v532_v22  ;;  %486 = vmatprep.subr.bf16.mxu1 %v547_v34 }
  0x55   :  { %191 = vmatpush1.bf16.msra.mxu0 %v534_v25  ;;  %487 = vmatpush3.bf16.msra.mxu1 %v548_v35 }
  0x56   :  { %488 = vmatprep.subr.bf16.mxu1 %v549_v36 }
  0x58   :  { %209 = vmatmul.mubr.bf16.vlgmr.msra.gmra.mrb[0].mxu0 %v66_v30 }
  0x59   :  { %218 = vmatprep.mubr.bf16.mxu0 %v652_v0  ;;  %489 = vmatpush3.bf16.msra.mxu1 %v550_v37 }
  0x60   :  { %219 = vmatmul.mubr.bf16.gmra.mrb[4].mxu0 %v67_v32 }
 0x12b   :  { %v210_v45 = vpop.f32.mrb[0].mxu0 }
 0x12c   :  { %v211_v46 = vadd.f32 %v210_v45, %v89_v43  ;;  %v212_v47 = vpop.f32.mrb[1].mxu0 }
 0x12d   :  { %v213_v48 = vadd.f32 %v212_v47, %v93_v44  ;;  %v214_v49 = vpop.f32.mrb[2].mxu0 }
 0x12e   :  { %v215_v50 = vadd.f32 %v214_v49, %v89_v43  ;;  %v216_v51 = vpop.f32.mrb[3].mxu0  ;;  %v227_v53 = vmax.f32 %v211_v46, 0.0 }
 0x12f   :  { %v217_v52 = vadd.f32 %v216_v51, %v93_v44  ;;  %v228_v55 = vmax.f32 %v213_v48, 0.0 }
 0x130   :  { %v229_v54 = vmax.f32 %v215_v50, 0.0 }
 0x131   :  { %v230_v56 = vmax.f32 %v217_v52, 0.0 }
 0x132   :  { %v233_v57 = vpack.c.bf16 %v229_v54, %v227_v53 }
 0x133   :  { %v220_v58 = vpop.f32.mrb[4].mxu0  ;;  %v234_v59 = vpack.c.bf16 %v230_v56, %v228_v55 }
 0x134   :  { %v221_v60 = vadd.f32 %v220_v58, %v89_v43  ;;  %v222_v61 = vpop.f32.mrb[5].mxu0 }
 0x135   :  { %v223_v62 = vadd.f32 %v222_v61, %v93_v44  ;;  %v224_v63 = vpop.f32.mrb[6].mxu0  ;;  %404 = vmatprep.mubr.bf16.mxu1 %v234_v59 }
 0x136   :  { %v225_v0 = vpop.f32.mrb[7].mxu0  ;;  %405 = vmatmul.mubr.bf16.vlgmr.msra.gmra.mrb[0].mxu1 %v233_v57  ;;  %v231_v2 = vmax.f32 %v221_v60, 0.0 }
 0x137   :  { %v232_v1 = vmax.f32 %v223_v62, 0.0 }
 0x138   :  { %v235_v4 = vpack.c.bf16 %v231_v2, %v231_v2 }
 0x139   :  { %v236_v3 = vpack.c.bf16 %v232_v1, %v232_v1 }
 0x13b   :  { %412 = vmatprep.mubr.bf16.mxu1 %v236_v3 }
 0x13e   :  { %413 = vmatmul.mubr.bf16.gmra.mrb[4].mxu1 %v235_v4 }
 0x209   :  { %v490_v5 = vpop.f32.mrb[0].mxu1 }
 0x20a   :  { %v491_v7 = vpop.f32.mrb[1].mxu1 }
 0x20b   :  { %v492_v8 = vadd.f32 %v491_v7, %v490_v5  ;;  %v493_v9 = vpop.f32.mrb[2].mxu1 }
 0x20c   :  { %v494_v10 = vpop.f32.mrb[3].mxu1 }
 0x20d   :  { %v407_v11 = vadd.f32 %v492_v8, %v457_v6  ;;  %v495_v12 = vadd.f32 %v494_v10, %v493_v9 }
 0x20f   :  { %420 = vst [vmem:[#allocation8] sm:$0xff] %v407_v11  ;;  %v410_v13 = vadd.f32 %v495_v12, %v457_v6 }
 0x211   :  { %421 = vst [vmem:[#allocation8 + $0x8] sm:$0xff] %v410_v13  ;;  %v496_v14 = vpop.f32.mrb[4].mxu1 }
 0x212   :  { %v497_v15 = vpop.f32.mrb[5].mxu1 }
 0x213   :  { %v498_v16 = vadd.f32 %v497_v15, %v496_v14  ;;  %v499_v17 = vpop.f32.mrb[6].mxu1 }
 0x214   :  { %v500_v18 = vpop.f32.mrb[7].mxu1 }
 0x215   :  { %v415_v19 = vadd.f32 %v498_v16, %v457_v6 }
 0x217   :  { %422 = vst [vmem:[#allocation8 + $0x10] sm:$0xff] %v415_v19 }
 0x218   :  { %628 = shalt.err (!%p625_p0)
}
 0x219   :  { %s629_s14 = scalar_lea.hbm %s759_s5, 384 }
 0x21a   :  { %p630_p1 = scmp.ne.s32.totalorder %s759_s5, %s629_s14  ;;  %p633_p2 = scmp.lt.u32.totalorder %s629_s14, %s759_s5 }
 0x21c   :  { %p635_p3 = pnand %p633_p2, %p630_p1 }
 0x21e   :  { %638 = shalt.err (!%p635_p3)
}
 0x21f   :  { %434 = dma.vmem_to_hbm [thread:$0]  %s429_s11, 384, %s759_s5, [#allocation4], %s647_s30, %s647_s30, %s648_s6  }
 0x220   :  { %643 = dma.done.wait [#allocation4], 384  }
 0x221   :  { %644 = vsyncadd [#allocation4], 4294966912 }
 0x222   :  { %438 = vsyncpa [#allocation3], 1 }
 0x223   :  { %439 = vsyncpa [#allocation6], 1 }
 0x224   :  { %440 = vsyncpa [#allocation4], 1 }

</bundles_post_ra>
